<compile_context>
chip_gen: v5e
topology: v5e:2x2
jax: 0.10.0
libtpu: 0.0.40
codegen_flags: <defaults>
</compile_context>

<pallas_src>
import functools

import jax
import jax.numpy as jnp
from jax.experimental import pallas as pl
from jax.experimental.pallas import tpu as pltpu


def _round_up(a, b):
    return ((a + b - 1) // b) * b


def _select_tile(dim, max_tile, align):
    """Pick a tile size (multiple of `align`, <= max_tile) that minimizes the
    padded extent of `dim`; prefer the largest tile among equal-padding ones."""
    max_tile = max(align, (max_tile // align) * align)
    best_t = align
    best_pad = _round_up(dim, align) - dim
    t = align
    while t < max_tile:
        t = min(t * 2, max_tile)
        pad = _round_up(dim, t) - dim
        if pad <= best_pad:
            best_t, best_pad = t, pad
    return best_t


# ---------------------------------------------------------------------------
# Kernels
# ---------------------------------------------------------------------------
def _linear_kernel_nobias(x_ref, w_ref, o_ref, acc_ref):
    # x_ref: (tm, tk)  w_ref: (tk, tn)  o_ref: (tm, tn)  acc_ref: (tm, tn) f32
    k = pl.program_id(2)
    part = jnp.dot(x_ref[...].astype(w_ref.dtype), w_ref[...],
                   preferred_element_type=jnp.float32)

    @pl.when(k == 0)
    def _():
        acc_ref[...] = part          # no zero-init + reload on the first step

    @pl.when(k > 0)
    def _():
        acc_ref[...] += part

    @pl.when(k == pl.num_programs(2) - 1)
    def _():
        o_ref[...] = acc_ref[...].astype(o_ref.dtype)


def _linear_kernel_bias(x_ref, w_ref, b_ref, o_ref, acc_ref):
    # b_ref: (1, tn) float32, added exactly once in the f32 epilogue.
    k = pl.program_id(2)
    part = jnp.dot(x_ref[...].astype(w_ref.dtype), w_ref[...],
                   preferred_element_type=jnp.float32)

    @pl.when(k == 0)
    def _():
        acc_ref[...] = part

    @pl.when(k > 0)
    def _():
        acc_ref[...] += part

    @pl.when(k == pl.num_programs(2) - 1)
    def _():
        o_ref[...] = (acc_ref[...] + b_ref[...]).astype(o_ref.dtype)


# ---------------------------------------------------------------------------
# Forward (jitted; weight/bias already prepared and padded)
# ---------------------------------------------------------------------------
@functools.partial(
    jax.jit,
    static_argnames=("out_features", "tm_max", "tn", "tk", "weight_buffers"))
def _linear_forward(x, w_pad, b_pad, *, out_features, tm_max, tn, tk,
                    weight_buffers=3):
    if not jnp.issubdtype(x.dtype, jnp.floating):
        raise TypeError(f"linear_forward expects floating-point x, got {x.dtype}")

    K = x.shape[-1]
    K_pad, N_pad = w_pad.shape
    if _round_up(K, tk) != K_pad:
        raise ValueError("x feature dim does not match the prepared weight")

    orig_batch = x.shape[:-1]
    x2d = x.reshape(-1, K)
    M = x2d.shape[0]

    # --- per-call tile selection (N/K tiling was fixed at weight prep) -----
    tm = _select_tile(M, tm_max, 8)
    tn_ = tn
    M_pad = _round_up(M, tm)

    # Keep >= 2 tiles over the "parallel" (M, N) axes when possible so both
    # v7x TensorCores get work (harmless on single-core v5e / v6e).
    while ((M_pad // tm) * (N_pad // tn_) < 2
           and tn_ >= 256 and (tn_ // 2) % 128 == 0):
        tn_ //= 2

    grid = (M_pad // tm, N_pad // tn_, K_pad // tk)

    # --- pad activations only when actually needed --------------------------
    if M_pad != M or K_pad != K:
        x2d = jnp.pad(x2d, ((0, M_pad - M), (0, K_pad - K)))

    # --- small-M (GEMV-like) path: deeper buffering on the streamed weight --
    w_spec_kwargs = {}
    if M <= 128 and grid[2] >= 3 and weight_buffers > 2:
        w_spec_kwargs["pipeline_mode"] = pl.Buffered(weight_buffers)
    w_bufs = weight_buffers if "pipeline_mode" in w_spec_kwargs else 2

    # --- VMEM budget from the real double-buffered footprint (+headroom) ----
    x_bytes = jnp.dtype(x.dtype).itemsize
    w_bytes = jnp.dtype(w_pad.dtype).itemsize
    o_bytes = jnp.dtype(x.dtype).itemsize
    footprint = (2 * tm * tk * x_bytes          # x tiles (double buffered)
                 + w_bufs * tk * tn_ * w_bytes  # weight tiles
                 + 2 * tm * tn_ * o_bytes       # output tiles
                 + tm * tn_ * 4                 # f32 accumulator scratch
                 + 2 * tn_ * 4)                 # bias tiles
    vmem_limit = min(max(int(footprint * 1.3) + (2 << 20), 16 << 20), 64 << 20)

    in_specs = [
        pl.BlockSpec((tm, tk), lambda i, j, k: (i, k)),                 # x
        pl.BlockSpec((tk, tn_), lambda i, j, k: (k, j), **w_spec_kwargs),  # W.T
    ]
    operands = [x2d, w_pad]
    if b_pad is not None:
        in_specs.append(pl.BlockSpec((1, tn_), lambda i, j, k: (0, j)))  # bias
        operands.append(b_pad)
        kernel = _linear_kernel_bias
    else:
        kernel = _linear_kernel_nobias

    out = pl.pallas_call(
        kernel,
        out_shape=jax.ShapeDtypeStruct((M_pad, N_pad), x.dtype),
        grid_spec=pltpu.PrefetchScalarGridSpec(
            num_scalar_prefetch=0,
            grid=grid,
            in_specs=in_specs,
            out_specs=pl.BlockSpec((tm, tn_), lambda i, j, k: (i, j)),
            scratch_shapes=[pltpu.VMEM((tm, tn_), jnp.float32)],
        ),
        compiler_params=pltpu.CompilerParams(
            dimension_semantics=("parallel", "parallel", "arbitrary"),
            vmem_limit_bytes=vmem_limit,
        ),
    )(*operands)

    out = out[:M, :out_features]
    return out.reshape(*orig_batch, out_features)


# ---------------------------------------------------------------------------
# Module wrapper: prepares weight/bias ONCE (cast + transpose + pad)
# ---------------------------------------------------------------------------
class PallasLinear:
    """y = x @ W.T + b with weight layout plumbing done once at construction.

    compute_dtype=None keeps the weight dtype (f32 -> matches torch Linear);
    pass jnp.bfloat16 to opt in to bf16 MXU inputs (f32 accumulation).
    """

    def __init__(self, weight, bias=None, *, compute_dtype=None,
                 tm=512, tn=512, tk=1024, weight_buffers=3):
        weight = jnp.asarray(weight)
        if compute_dtype is None:
            compute_dtype = weight.dtype
        self.out_features, self.in_features = weight.shape
        self.tm_max = int(tm)
        self.weight_buffers = int(weight_buffers)

        # Tile N / K once; the padded weight layout bakes them in.
        self.tn = _select_tile(self.out_features, tn, 128)
        self.tk = _select_tile(self.in_features, tk, 128)
        N_pad = _round_up(self.out_features, self.tn)
        K_pad = _round_up(self.in_features, self.tk)

        # One-time: (out,in) -> (K_pad, N_pad) in the compute dtype.
        w_t = weight.T.astype(compute_dtype)
        if w_t.shape != (K_pad, N_pad):
            w_t = jnp.pad(w_t, ((0, K_pad - self.in_features),
                                (0, N_pad - self.out_features)))
        self.w_pad = w_t

        if bias is not None:
            b = jnp.asarray(bias).astype(jnp.float32)
            self.b_pad = jnp.pad(
                b, (0, N_pad - self.out_features)).reshape(1, N_pad)
        else:
            self.b_pad = None

    def __call__(self, x):
        return _linear_forward(
            x, self.w_pad, self.b_pad,
            out_features=self.out_features,
            tm_max=self.tm_max, tn=self.tn, tk=self.tk,
            weight_buffers=self.weight_buffers)


# ---------------------------------------------------------------------------
# Parameter init (JAX re-implementation of the torch weight_init)
# ---------------------------------------------------------------------------
def weight_init(key, shape, mode, fan_in, fan_out):
    if mode == 'xavier_uniform':
        return jnp.sqrt(6.0 / (fan_in + fan_out)) * jax.random.uniform(
            key, shape, minval=-1.0, maxval=1.0)
    if mode == 'xavier_normal':
        return jnp.sqrt(2.0 / (fan_in + fan_out)) * jax.random.normal(key, shape)
    if mode == 'kaiming_uniform':
        return jnp.sqrt(3.0 / fan_in) * jax.random.uniform(
            key, shape, minval=-1.0, maxval=1.0)
    if mode == 'kaiming_normal':
        return jnp.sqrt(1.0 / fan_in) * jax.random.normal(key, shape)
    raise ValueError(f'Invalid init mode "{mode}"')


def init_linear_params(key, in_features, out_features, bias=True,
                       init_mode='kaiming_normal', init_weight=1.0,
                       init_bias=0.0):
    kw, kb = jax.random.split(key)
    w = weight_init(kw, (out_features, in_features), mode=init_mode,
                    fan_in=in_features, fan_out=out_features) * init_weight
    b = None
    if bias:
        b = weight_init(kb, (out_features,), mode=init_mode,
                        fan_in=in_features, fan_out=out_features) * init_bias
    return w.astype(jnp.float32), (None if b is None else b.astype(jnp.float32))


if __name__ == "__main__":
    key = jax.random.PRNGKey(0)
    k_param, k_x = jax.random.split(key)

    batch, in_features, out_features = 8, 32, 64
    weight, bias = init_linear_params(k_param, in_features, out_features,
                                      bias=True)
    x = jax.random.normal(k_x, (batch, in_features), dtype=jnp.float32)

    # f32 reference (exact PyTorch Linear semantics).
    y_ref = x @ weight.T + bias

    # 1) default f32 path, with bias
    lin = PallasLinear(weight, bias)
    y = jax.block_until_ready(lin(x))
    assert y.shape == (batch, out_features)
    assert jnp.allclose(y, y_ref, atol=3e-2, rtol=3e-2), float(
        jnp.max(jnp.abs(y - y_ref)))

    # 2) bias-less kernel variant
    lin_nb = PallasLinear(weight, None)
    y_nb = jax.block_until_ready(lin_nb(x))
    assert jnp.allclose(y_nb, x @ weight.T, atol=3e-2, rtol=3e-2)

    # 3) opt-in bf16 compute path (f32 accumulation)
    lin_bf16 = PallasLinear(weight, bias, compute_dtype=jnp.bfloat16)
    y_bf16 = jax.block_until_ready(lin_bf16(x))
    assert jnp.allclose(y_bf16, y_ref, atol=6e-2, rtol=6e-2)

    print("KERNEL_OK")
</pallas_src>

<mosaic_0001>
module attributes {stable_mosaic.version = 11 : i64} {
  func.func @_linear_kernel_bias(%arg0: i32, %arg1: i32, %arg2: i32, %arg3: memref<8x128xf32, #tpu.memory_space<vmem>>, %arg4: memref<128x128xf32, #tpu.memory_space<vmem>>, %arg5: memref<1x128xf32, #tpu.memory_space<vmem>>, %arg6: memref<8x128xf32, #tpu.memory_space<vmem>>, %arg7: memref<8x128xf32, #tpu.memory_space<vmem>>) attributes {dimension_semantics = [#tpu.dimension_semantics<parallel>, #tpu.dimension_semantics<parallel>, #tpu.dimension_semantics<arbitrary>], iteration_bounds = array<i64: 1, 1, 1>, scalar_prefetch = 0 : i64, scratch_operands = 1 : i64, tpu.core_type = #tpu.core_type<tc>, window_params = [{transform_indices = @transform_0, window_bounds = array<i64: 8, 128>}, {transform_indices = @transform_1, window_bounds = array<i64: 128, 128>}, {transform_indices = @transform_2, window_bounds = array<i64: 1, 128>}, {transform_indices = @transform_3, window_bounds = array<i64: 8, 128>}]} {
    %c0 = arith.constant 0 : index
    %c0_0 = arith.constant 0 : index
    %0 = vector.load %arg3[%c0, %c0_0] : memref<8x128xf32, #tpu.memory_space<vmem>>, vector<8x128xf32>
    %c0_1 = arith.constant 0 : index
    %c0_2 = arith.constant 0 : index
    %1 = vector.load %arg4[%c0_1, %c0_2] : memref<128x128xf32, #tpu.memory_space<vmem>>, vector<128x128xf32>
    %cst = arith.constant dense<0.000000e+00> : vector<8x128xf32>
    %2 = tpu.matmul %0, %1, %cst {dimension_numbers = #tpu.dot_dimension_numbers<[1], [0], [0], [1], [0, 0, 1, 1], [], []>} : vector<8x128xf32>, vector<128x128xf32>, vector<8x128xf32> -> vector<8x128xf32>
    %c0_i32 = arith.constant 0 : i32
    %3 = arith.cmpi eq, %arg2, %c0_i32 : i32
    %4 = arith.extui %3 : i1 to i32
    %c0_i32_3 = arith.constant 0 : i32
    %5 = arith.cmpi ne, %4, %c0_i32_3 : i32
    scf.if %5 {
      %c0_8 = arith.constant 0 : index
      %c0_9 = arith.constant 0 : index
      %12 = vector.load %arg7[%c0_8, %c0_9] : memref<8x128xf32, #tpu.memory_space<vmem>>, vector<8x128xf32>
      tpu.vector_store %arg7[%c0_8, %c0_9], %2 {strides = array<i32>} : memref<8x128xf32, #tpu.memory_space<vmem>>, vector<8x128xf32>,
    } else {
    }
    %c0_i32_4 = arith.constant 0 : i32
    %6 = arith.cmpi sgt, %arg2, %c0_i32_4 : i32
    %7 = arith.extui %6 : i1 to i32
    %c0_i32_5 = arith.constant 0 : i32
    %8 = arith.cmpi ne, %7, %c0_i32_5 : i32
    scf.if %8 {
      %c0_8 = arith.constant 0 : index
      %c0_9 = arith.constant 0 : index
      %12 = vector.load %arg7[%c0_8, %c0_9] : memref<8x128xf32, #tpu.memory_space<vmem>>, vector<8x128xf32>
      %13 = arith.addf %12, %2 : vector<8x128xf32>
      %c0_10 = arith.constant 0 : index
      %c0_11 = arith.constant 0 : index
      %14 = vector.load %arg7[%c0_10, %c0_11] : memref<8x128xf32, #tpu.memory_space<vmem>>, vector<8x128xf32>
      tpu.vector_store %arg7[%c0_10, %c0_11], %13 {strides = array<i32>} : memref<8x128xf32, #tpu.memory_space<vmem>>, vector<8x128xf32>,
    } else {
    }
    %c0_i32_6 = arith.constant 0 : i32
    %9 = arith.cmpi eq, %arg2, %c0_i32_6 : i32
    %10 = arith.extui %9 : i1 to i32
    %c0_i32_7 = arith.constant 0 : i32
    %11 = arith.cmpi ne, %10, %c0_i32_7 : i32
    scf.if %11 {
      %c0_8 = arith.constant 0 : index
      %c0_9 = arith.constant 0 : index
      %12 = vector.load %arg7[%c0_8, %c0_9] : memref<8x128xf32, #tpu.memory_space<vmem>>, vector<8x128xf32>
      %c0_10 = arith.constant 0 : index
      %c0_11 = arith.constant 0 : index
      %13 = vector.load %arg5[%c0_10, %c0_11] : memref<1x128xf32, #tpu.memory_space<vmem>>, vector<1x128xf32>
      %14 = vector.broadcast %13 : vector<1x128xf32> to vector<8x128xf32>
      %15 = arith.addf %12, %14 : vector<8x128xf32>
      %c0_12 = arith.constant 0 : index
      %c0_13 = arith.constant 0 : index
      %16 = vector.load %arg6[%c0_12, %c0_13] : memref<8x128xf32, #tpu.memory_space<vmem>>, vector<8x128xf32>
      tpu.vector_store %arg6[%c0_12, %c0_13], %15 {strides = array<i32>} : memref<8x128xf32, #tpu.memory_space<vmem>>, vector<8x128xf32>,
    } else {
    }
    return
  }
  func.func @transform_0(%arg0: i32, %arg1: i32, %arg2: i32) -> (i32, i32) {
    %c0_i32 = arith.constant 0 : i32
    return %arg0, %arg2 : i32, i32
  }
  func.func @transform_1(%arg0: i32, %arg1: i32, %arg2: i32) -> (i32, i32) {
    %c0_i32 = arith.constant 0 : i32
    return %arg2, %arg1 : i32, i32
  }
  func.func @transform_2(%arg0: i32, %arg1: i32, %arg2: i32) -> (i32, i32) {
    %c0_i32 = arith.constant 0 : i32
    %c0_i32_0 = arith.constant 0 : i32
    return %c0_i32, %arg1 : i32, i32
  }
  func.func @transform_3(%arg0: i32, %arg1: i32, %arg2: i32) -> (i32, i32) {
    %c0_i32 = arith.constant 0 : i32
    return %arg0, %arg1 : i32, i32
  }
}

</mosaic_0001>

<bundles_post_ra>
// kernel: _linear_forward.1
= control target key start
LH: loop header
LB: loop body
LE: loop exit
PB: predicated region body
PF: predicated region fallthrough
CT: control target
= control target key end

     0   :  { %8 = vsyncpa [#allocation4], 0  ;;  %s200_s0 = inlined_call_operand.vmem [shape: f32[8,128], index: 0, kind: input, shape index: {}]   ;;  %s201_s1 = inlined_call_operand.hbm [shape: f32[128,128], index: 1, kind: input, shape index: {}]   ;;  %s202_s2 = inlined_call_operand.vmem [shape: f32[1,128], index: 2, kind: input, shape index: {}]   ;;  %s203_s3 = inlined_call_operand.hbm [shape: f32[8,128], index: 3, kind: output, shape index: {}]  }
   0x1   :  { %9 = vsyncpa [#allocation5], 0  ;;  %s16_s14 = sshll.u32 %s201_s1, 4  ;;  %s164_s15 = smov [#allocation3]   ;;  %s17_s14 = int_to_ptr.hbm [resolvable:$true] %s16_s14 }
   0x2   :  { %s18_s16 = sshll.u32 %s164_s15, 4  ;;  %s165_s17 = smov 128   ;;  %s19_s16 = int_to_ptr.vmem [resolvable:$true] %s18_s16 }
   0x3   :  { %s166_s18 = smov 8  }
   0x4   :  { %24 = dma.hbm_to_vmem [thread:$0]  %s17_s14, 2048, %s19_s16, [#allocation4], %s165_s17, %s165_s17, %s166_s18  }
   0x5   :  { %160 = dma.done.wait [#allocation4], 2048  }
   0x6   :  { %161 = vsyncadd [#allocation4], 4294965248  ;;  %v47_v0 = vld [vmem:[#allocation3 + $0x78] sm:$0xff]  ;;  %v46_v1 = vld [vmem:[#allocation3 + $0x70] sm:$0xff]  ;;  %s167_s22 = smov [#allocation6]   ;;  %s97_s26 = sshll.u32 %s203_s3, 4  ;;  %s98_s26 = int_to_ptr.hbm [resolvable:$true] %s97_s26 }
   0x7   :  { %48 = vmatpush.msra.mxu0 %v47_v0  ;;  %v45_v2 = vld [vmem:[#allocation3 + $0x68] sm:$0xff]  ;;  %v44_v3 = vld [vmem:[#allocation3 + $0x60] sm:$0xff]  ;;  %v43_v4 = vld [vmem:[#allocation3 + $0x58] sm:$0xff]  ;;  %s95_s23 = sshll.u32 %s167_s22, 4  ;;  %s96_s23 = int_to_ptr.vmem [resolvable:$true] %s95_s23 }
   0x8   :  { %v42_v5 = vld [vmem:[#allocation3 + $0x50] sm:$0xff]  ;;  %v41_v6 = vld [vmem:[#allocation3 + $0x48] sm:$0xff]  ;;  %v40_v7 = vld [vmem:[#allocation3 + $0x40] sm:$0xff] }
   0x9   :  { %49 = vmatpush.msra.mxu0 %v46_v1  ;;  %v39_v8 = vld [vmem:[#allocation3 + $0x38] sm:$0xff]  ;;  %v38_v9 = vld [vmem:[#allocation3 + $0x30] sm:$0xff]  ;;  %v37_v10 = vld [vmem:[#allocation3 + $0x28] sm:$0xff] }
   0xa   :  { %v36_v11 = vld [vmem:[#allocation3 + $0x20] sm:$0xff]  ;;  %v35_v12 = vld [vmem:[#allocation3 + $0x18] sm:$0xff]  ;;  %v34_v13 = vld [vmem:[#allocation3 + $0x10] sm:$0xff] }
   0xb   :  { %50 = vmatpush.msra.mxu0 %v45_v2  ;;  %v33_v14 = vld [vmem:[#allocation3 + $0x8] sm:$0xff]  ;;  %v32_v15 = vld [vmem:[#allocation3] sm:$0xff] }
   0xc   :  { %v31_v16 = vld [vmem:[%s200_s0] sm:$0xff] }
   0xd   :  { %51 = vmatpush.msra.mxu0 %v44_v3  ;;  %v111_v17 = vld [vmem:[%s202_s2] ss:$0 sm:$0xff] }
   0xf   :  { %52 = vmatpush.msra.mxu0 %v43_v4 }
  0x11   :  { %53 = vmatpush.msra.mxu0 %v42_v5 }
  0x13   :  { %54 = vmatpush.msra.mxu0 %v41_v6 }
  0x15   :  { %55 = vmatpush.msra.mxu0 %v40_v7 }
  0x17   :  { %56 = vmatpush.msra.mxu0 %v39_v8 }
  0x19   :  { %57 = vmatpush.msra.mxu0 %v38_v9 }
  0x1b   :  { %58 = vmatpush.msra.mxu0 %v37_v10 }
  0x1d   :  { %59 = vmatpush.msra.mxu0 %v36_v11 }
  0x1f   :  { %60 = vmatpush.msra.mxu0 %v35_v12 }
  0x21   :  { %61 = vmatpush.msra.mxu0 %v34_v13 }
  0x23   :  { %62 = vmatpush.msra.mxu0 %v33_v14 }
  0x25   :  { %63 = vmatpush.msra.mxu0 %v32_v15 }
  0x26   :  { %64 = vmatmul.f32.vlgmr.msra.gmra.mxu0 %v31_v16 }
  0xa3   :  { %v65_v18 = vpop.f32.mrf.mxu0 }
  0xa4   :  { %v88_v19 = vadd.f32 %v111_v17, %v65_v18 }
  0xa6   :  { %89 = vst [vmem:[#allocation6] sm:$0xff] %v88_v19 }
  0xa7   :  { %100 = dma.vmem_to_hbm [thread:$0]  %s96_s23, 128, %s98_s26, [#allocation5]  }
  0xa8   :  { %162 = dma.done.wait [#allocation5], 128  }
  0xa9   :  { %163 = vsyncadd [#allocation5], 4294967168 }
  0xaa   :  { %105 = vsyncpa [#allocation4], 1 }
  0xab   :  { %106 = vsyncpa [#allocation5], 1 }

</bundles_post_ra>
